<compile_context>
chip_gen: v6e
topology: v6e:2x2x1
jax: 0.10.0
libtpu: 0.0.40
codegen_flags: <defaults>
</compile_context>

<pallas_src>
import jax
import jax.numpy as jnp
from jax.experimental import pallas as pl
from jax.experimental.pallas import tpu as pltpu


# ---------------------------------------------------------------------------
# Kernel
# ---------------------------------------------------------------------------
def weighted_sum_kernel(outs_ref, w_ref, out_ref):
    """out[b, n] = sum_c outs[b, c, n] * w[b, c], C statically unrolled.

    outs_ref : (TB, C, TN)  feature tile, native input dtype
    w_ref    : (TB, C)      per-sample normalized weights (precomputed, f32)
    out_ref  : (TB, TN)     output tile (f32 by default)
    """
    c = outs_ref.shape[1]
    # Unrolled VPU multiply-accumulate into a 2-D f32 accumulator: avoids the
    # (TB, C, TN) f32 temporary and the masked cross-sublane (XLU) reduce.
    acc = outs_ref[:, 0, :].astype(jnp.float32) * w_ref[:, 0:1]
    for ci in range(1, c):
        acc = acc + outs_ref[:, ci, :].astype(jnp.float32) * w_ref[:, ci:ci + 1]
    out_ref[...] = acc.astype(out_ref.dtype)


# ---------------------------------------------------------------------------
# Parameter init (mirror of WeightedSum.set_weights, mode='tensor')
# ---------------------------------------------------------------------------
def init_weight_tensor(number_modals, outchannels=1, probabilities=None):
    if probabilities is not None:
        tt = jnp.asarray(probabilities, dtype=jnp.float32)
    else:
        tt = jnp.ones((number_modals, outchannels), dtype=jnp.float32)
    return tt / jnp.sum(tt, axis=0, keepdims=True)          # (C, outchannels)


# ---------------------------------------------------------------------------
# Wrapper
# ---------------------------------------------------------------------------
def _round_up(x, m):
    return ((x + m - 1) // m) * m


def _vmem_budget_and_limit():
    """Per-generation VMEM sizing. v5e/v6e: 128 MiB; v7x: 64 MiB per core."""
    phys = None
    try:
        info = pltpu.get_tpu_info()
        phys = getattr(info, "vmem_capacity_bytes", None)
    except Exception:
        phys = None
    if not phys:
        phys = 64 * 1024 * 1024            # conservative fallback = v7x per-core VMEM
    limit = int(phys * 0.70)               # leave headroom for compiler scratch
    budget = int(limit * 0.85)             # tile-selection budget < compiler limit
    return budget, limit


def weighted_sum_tensor(outs, availability, base_weight, *,
                        tile_n=None, tile_b=None, out_dtype=jnp.float32):
    b, c, n = outs.shape
    co = base_weight.shape[-1] if base_weight.ndim > 1 else 1
    assert co == 1, "mode='tensor' forward only supports outchannels == 1"

    # ---- hoist the per-sample weight normalization out of the kernel --------
    # Tile-invariant, so the kernel is a pure streaming multiply-add reduce.
    # NOTE: an all-zero availability row divides by zero, like the reference.
    w = base_weight.reshape(1, c).astype(jnp.float32) * availability.astype(jnp.float32)
    w = w / jnp.sum(w, axis=-1, keepdims=True)               # (B, C)

    # ---- VMEM footprint model (padding-aware) --------------------------------
    itemsize = jnp.dtype(outs.dtype).itemsize
    out_itemsize = jnp.dtype(out_dtype).itemsize
    in_sub = 8 * max(1, 4 // itemsize)       # sublane multiple: 8 f32 / 16 bf16 / 32 i8
    out_sub = 8 * max(1, 4 // out_itemsize)
    padded_c = _round_up(c, in_sub)          # C sits in the sublane dim -> padded

    budget, vmem_limit = _vmem_budget_and_limit()

    # ---- batch tile: multiple of 8 (or the full batch dim) -------------------
    if b <= 8:
        tb = b                                                # full dim, always legal
    else:
        want = 64 if tile_b is None else max(1, tile_b)
        tb = min(_round_up(want, 8), b)                       # multiple of 8, or == b

    def footprint(tn):
        return (2 * tb * padded_c * _round_up(tn, 128) * itemsize          # outs (dbl-buffered)
                + 2 * _round_up(tb, out_sub) * _round_up(tn, 128) * out_itemsize  # out
                + 2 * _round_up(tb, 8) * 128 * 4)                           # w (lane-padded)

    # ---- feature tile: lane-dense, as large as the VMEM budget allows --------
    n_pad = _round_up(n, 128)
    tn = 8192 if tile_n is None else tile_n
    tn = max(128, (min(tn, n_pad) // 128) * 128)
    while tn > 128 and footprint(tn) > budget:
        tn -= 128

    # ---- guarantee >=2 grid steps on a parallel axis (v7x megacore) ----------
    if pl.cdiv(b, tb) == 1 and pl.cdiv(n, tn) == 1:
        if n > 128:
            tn = max(128, _round_up(pl.cdiv(n, 2), 128))
        elif b > 8:
            tb = max(8, _round_up(pl.cdiv(b, 2), 8))

    if tn >= n:
        tn = n                                                # full dim, always legal

    # Grid order: batch tiles outer, feature tiles inner.  With j innermost the
    # (tb, C) weight block index is constant across feature tiles, so Pallas
    # skips re-DMAing w each step.  Do not swap these axes.
    grid = (pl.cdiv(b, tb), pl.cdiv(n, tn))

    return pl.pallas_call(
        weighted_sum_kernel,
        out_shape=jax.ShapeDtypeStruct((b, n), out_dtype),
        grid_spec=pl.GridSpec(
            grid=grid,
            in_specs=[
                pl.BlockSpec((tb, c, tn), lambda i, j: (i, 0, j)),
                pl.BlockSpec((tb, c), lambda i, j: (i, 0)),
            ],
            out_specs=pl.BlockSpec((tb, tn), lambda i, j: (i, j)),
        ),
        compiler_params=pltpu.CompilerParams(
            dimension_semantics=("parallel", "parallel"),
            vmem_limit_bytes=vmem_limit,
        ),
    )(outs, w)


# ---------------------------------------------------------------------------
# Pure-JAX reference (port of the PyTorch forward, mode='tensor')
# ---------------------------------------------------------------------------
def reference(outs, availability, base_weight):
    b, c, n = outs.shape
    W = jnp.broadcast_to(base_weight.reshape(1, c), (b, c))
    W = W * availability
    W = W / jnp.sum(W, axis=-1, keepdims=True)
    return jnp.einsum("bcn,bc->bn", outs.astype(jnp.float32), W)


if __name__ == "__main__":
    B, C, N = 2, 4, 256              # batch, number_modals, feature length

    key = jax.random.PRNGKey(0)
    k_outs, k_avail = jax.random.split(key)

    outs = jax.random.normal(k_outs, (B, C, N), dtype=jnp.float32)

    # binary availability mask; guarantee at least one available modality/row
    availability = (jax.random.uniform(k_avail, (B, C)) > 0.4).astype(jnp.float32)
    availability = availability.at[:, 0].set(1.0)

    # deterministic parameter init (probabilities given explicitly)
    probabilities = [[1.0], [2.0], [3.0], [4.0]]             # (C, outchannels=1)
    base_weight = init_weight_tensor(C, 1, probabilities)

    out = weighted_sum_tensor(outs, availability, base_weight)
    out = jax.block_until_ready(out)

    ref = reference(outs, availability, base_weight)
    assert out.shape == (B, N)
    assert jnp.allclose(out, ref, atol=1e-5, rtol=1e-5), "mismatch vs reference"

    print("KERNEL_OK")
</pallas_src>

<mosaic_0001>
module attributes {stable_mosaic.version = 11 : i64} {
  func.func @weighted_sum_kernel(%arg0: i32, %arg1: i32, %arg2: memref<2x4x128xf32, #tpu.memory_space<vmem>>, %arg3: memref<2x4xf32, #tpu.memory_space<vmem>>, %arg4: memref<2x128xf32, #tpu.memory_space<vmem>>) attributes {dimension_semantics = [#tpu.dimension_semantics<parallel>, #tpu.dimension_semantics<parallel>], iteration_bounds = array<i64: 1, 2>, scalar_prefetch = 0 : i64, scratch_operands = 0 : i64, tpu.core_type = #tpu.core_type<tc>, window_params = [{transform_indices = @transform_0, window_bounds = array<i64: 2, 4, 128>}, {transform_indices = @transform_1, window_bounds = array<i64: 2, 4>}, {transform_indices = @transform_2, window_bounds = array<i64: 2, 128>}]} {
    %c0 = arith.constant 0 : index
    %c0_0 = arith.constant 0 : index
    %c0_1 = arith.constant 0 : index
    %0 = vector.load %arg2[%c0, %c0_0, %c0_1] : memref<2x4x128xf32, #tpu.memory_space<vmem>>, vector<2x1x128xf32>
    %1 = vector.shape_cast %0 : vector<2x1x128xf32> to vector<2x128xf32>
    %c0_2 = arith.constant 0 : index
    %c0_3 = arith.constant 0 : index
    %2 = vector.load %arg3[%c0_2, %c0_3] : memref<2x4xf32, #tpu.memory_space<vmem>>, vector<2x1xf32>
    %3 = vector.broadcast %2 : vector<2x1xf32> to vector<2x128xf32>
    %4 = arith.mulf %1, %3 : vector<2x128xf32>
    %c0_4 = arith.constant 0 : index
    %c1 = arith.constant 1 : index
    %c0_5 = arith.constant 0 : index
    %5 = vector.load %arg2[%c0_4, %c1, %c0_5] : memref<2x4x128xf32, #tpu.memory_space<vmem>>, vector<2x1x128xf32>
    %6 = vector.shape_cast %5 : vector<2x1x128xf32> to vector<2x128xf32>
    %c0_6 = arith.constant 0 : index
    %c1_7 = arith.constant 1 : index
    %7 = vector.load %arg3[%c0_6, %c1_7] : memref<2x4xf32, #tpu.memory_space<vmem>>, vector<2x1xf32>
    %8 = vector.broadcast %7 : vector<2x1xf32> to vector<2x128xf32>
    %9 = arith.mulf %6, %8 : vector<2x128xf32>
    %10 = arith.addf %4, %9 : vector<2x128xf32>
    %c0_8 = arith.constant 0 : index
    %c2 = arith.constant 2 : index
    %c0_9 = arith.constant 0 : index
    %11 = vector.load %arg2[%c0_8, %c2, %c0_9] : memref<2x4x128xf32, #tpu.memory_space<vmem>>, vector<2x1x128xf32>
    %12 = vector.shape_cast %11 : vector<2x1x128xf32> to vector<2x128xf32>
    %c0_10 = arith.constant 0 : index
    %c2_11 = arith.constant 2 : index
    %13 = vector.load %arg3[%c0_10, %c2_11] : memref<2x4xf32, #tpu.memory_space<vmem>>, vector<2x1xf32>
    %14 = vector.broadcast %13 : vector<2x1xf32> to vector<2x128xf32>
    %15 = arith.mulf %12, %14 : vector<2x128xf32>
    %16 = arith.addf %10, %15 : vector<2x128xf32>
    %c0_12 = arith.constant 0 : index
    %c3 = arith.constant 3 : index
    %c0_13 = arith.constant 0 : index
    %17 = vector.load %arg2[%c0_12, %c3, %c0_13] : memref<2x4x128xf32, #tpu.memory_space<vmem>>, vector<2x1x128xf32>
    %18 = vector.shape_cast %17 : vector<2x1x128xf32> to vector<2x128xf32>
    %c0_14 = arith.constant 0 : index
    %c3_15 = arith.constant 3 : index
    %19 = vector.load %arg3[%c0_14, %c3_15] : memref<2x4xf32, #tpu.memory_space<vmem>>, vector<2x1xf32>
    %20 = vector.broadcast %19 : vector<2x1xf32> to vector<2x128xf32>
    %21 = arith.mulf %18, %20 : vector<2x128xf32>
    %22 = arith.addf %16, %21 : vector<2x128xf32>
    %c0_16 = arith.constant 0 : index
    %c0_17 = arith.constant 0 : index
    %23 = vector.load %arg4[%c0_16, %c0_17] : memref<2x128xf32, #tpu.memory_space<vmem>>, vector<2x128xf32>
    tpu.vector_store %arg4[%c0_16, %c0_17], %22 {strides = array<i32>} : memref<2x128xf32, #tpu.memory_space<vmem>>, vector<2x128xf32>,
    return
  }
  func.func @transform_0(%arg0: i32, %arg1: i32) -> (i32, i32, i32) {
    %c0_i32 = arith.constant 0 : i32
    %c0_i32_0 = arith.constant 0 : i32
    return %arg0, %c0_i32, %arg1 : i32, i32, i32
  }
  func.func @transform_1(%arg0: i32, %arg1: i32) -> (i32, i32) {
    %c0_i32 = arith.constant 0 : i32
    %c0_i32_0 = arith.constant 0 : i32
    return %arg0, %c0_i32 : i32, i32
  }
  func.func @transform_2(%arg0: i32, %arg1: i32) -> (i32, i32) {
    %c0_i32 = arith.constant 0 : i32
    return %arg0, %arg1 : i32, i32
  }
}

</mosaic_0001>

<bundles_post_ra>
// kernel: tpu_custom_call.1
= control target key start
LH: loop header
LB: loop body
LE: loop exit
PB: predicated region body
PF: predicated region fallthrough
CT: control target
= control target key end

     0   :  { %7 = vsyncpa [#allocation3], 0  ;;  %s811_s0 = inlined_call_operand.hbm [shape: f32[2,4,256], index: 0, kind: input, shape index: {}]   ;;  %s812_s1 = inlined_call_operand.hbm [shape: f32[2,4], index: 1, kind: input, shape index: {}]   ;;  %s813_s2 = inlined_call_operand.hbm [shape: f32[2,256], index: 2, kind: output, shape index: {}]  }
   0x1   :  { %9 = vsyncpa [#allocation3 + $0x1], 0 }
   0x2   :  { %10 = vsyncpa [#allocation6], 0 }
   0x3   :  { %11 = vsyncpa [#allocation4], 0 }
   0x4   :  { %13 = vsyncpa [#allocation4 + $0x1], 0  ;;  %s631_s9 = smov 0   ;;  %s633_s10 = smov 0  }
   0x5   :  { %s635_s11 = smov 0   ;;  %s637_s12 = smov 0  }
   0x6   :  { %s639_s13 = smov 0   ;;  %s641_s14 = smov 0  }
   0x7 LB: > { %s366_s15 = sadd.s32 4294967295, %s604_s14   ;;  %s367_s16 = sadd.s32 4294967294, %s604_s14   ;;  %s604_s14 = sphi %s641_s14, %s19_s14   ;;  %s600_s13 = sphi %s639_s13, %s832_s13   ;;  %s596_s12 = sphi %s637_s12, %s831_s12   ;;  %s592_s11 = sphi %s635_s11, %s830_s11   ;;  %s588_s10 = sphi %s633_s10, %s829_s10   ;;  %s584_s9 = sphi %s631_s9, %s828_s9  }
   0x8   : > { %s40_s17 = sadd.s32 1, %s592_s11  ;;  %p47_p0 = scmp.ne.s32.totalorder %s592_s11, %s588_s10 }
   0x9   : > { %p48_p1 = scmp.eq.s32.totalorder %s604_s14, 0  ;;  %p53_p2 = scmp.ne.s32.totalorder %s588_s10, %s584_s9 }
   0xa   : > { %p669_p3 = scmp.eq.s32.totalorder %s366_s15, 0  ;;  %p105_p4 = scmp.eq.s32.totalorder %s366_s15, 1 }
   0xb   : > { %p673_p5 = por %p48_p1, %p47_p0  ;;  %p111_p6 = scmp.eq.s32.totalorder %s367_s16, 1 }
   0xc   : > { %p679_p7 = por %p669_p3, %p53_p2  ;;  %p683_p8 = por %p105_p4, %p47_p0 }
   0xd   : > { %p687_p9 = por %p111_p6, %p53_p2  ;;  %p368_p10 = scmp.ge.s32.totalorder %s604_s14, 1 }
   0xe   : > { %s818_s20 = scalar_select %p679_p7, 1, 0 }
   0xf   : > { %s819_s21 = scalar_select %p683_p8, 1, 0 }
  0x10   : > { %s820_s22 = scalar_select %p687_p9, 1, 0 }
  0x11   : > { %p118_p11 = scmp.lt.s32.totalorder %s604_s14, 3  ;;  %s606_s24 = smov [#allocation5]  }
  0x12   : > { %s133_s25 = sshll.u32 %s606_s24, 4  ;;  %p402_p1 = scmp.lt.s32.totalorder %s604_s14, 2  ;;  %s134_s25 = int_to_ptr.vmem [resolvable:$true] %s133_s25 }
  0x13   : > { %p694_p13 = pnand %p368_p10, %p118_p11  ;;  %s28_s28 = sadd.s32 1, %s600_s13 }
  0x14   : > { %p703_p4 = pnand %p402_p1, %p673_p5  ;;  %p29_p6 = scmp.ge.s32.totalorder %s28_s28, 2 }
  0x15   : > { %p389_p0 = pneg %p694_p13  ;;  %s144_s29 = sand.u32 1, %s592_s11  }
  0x16   : > { %s477_s30 = scalar_lea.vmem %s134_s25, 32  ;;  %p485_p8 = scmp.lt.s32.totalorder %s134_s25, %s134_s25 }
  0x17   : > { %p709_p2 = pnand %p389_p0, %p669_p3  ;;  %p478_p11 = scmp.ne.s32.totalorder %s134_s25, %s477_s30 }
  0x18   : > { %p486_p5 = scmp.lt.s32.totalorder %s477_s30, %s477_s30 }
  0x19   : > { %p468_p10 = pneg %p709_p2 }
  0x1a   : > { %p487_p1 = por %p486_p5, %p485_p8 }
  0x1b   : > { %p480_p12 = pnand %p478_p11, %p468_p10 }
  0x1d   : > { %p481_p9 = pneg %p480_p12 }
  0x1f   : > { %p488_p7 = pnand %p487_p1, %p481_p9 }
  0x21   : > { %491 = shalt.err (!%p488_p7)
}
  0x22   : > { %392 = dma.hbm_to_vmem [thread:$0]  (!%p709_p2), %s812_s1, 32, %s134_s25, [#allocation6]  }
  0x23   : > { %s834_s28 = smov (%p29_p6, %s28_s28), 0  ;;  %s371_s5 = sshll.u32 %s144_s29, 3 }
  0x24   : > { %s36_s6 = ssub.s32 %s600_s13, %s834_s28  ;;  %s372_s7 = sshll.u32 %s600_s13, 6 }
  0x25   : > { %p38_p12 = scmp.eq.s32.totalorder %s36_s6, 0  ;;  %s156_s16 = scalar_lea.hbm %s811_s0, %s372_s7 }
  0x26   : > { %s148_s19 = scalar_lea.vmem [#allocation2], %s371_s5  ;;  %s145_s30 = scalar_lea.sflag [#allocation3], %s144_s29 }
  0x27   : > { %s157_s24 = sshll.u32 %s148_s19, 4  ;;  %p494_p7 = pneg %p703_p4  ;;  %s158_s24 = int_to_ptr.vmem [resolvable:$true] %s157_s24 }
  0x28   : > { %s733_s27 = scalar_select %p38_p12, %s592_s11, %s40_s17  }
  0x29   : > { %s505_s25 = scalar_lea.vmem %s158_s24, 128  ;;  %s607_s3 = smov [#allocation2]  }
  0x2a   : > { %p506_p8 = scmp.ne.s32.totalorder %s158_s24, %s505_s25  ;;  %s510_s4 = sshll.u32 %s607_s3, 4  ;;  %s511_s4 = int_to_ptr.vmem [resolvable:$false] %s510_s4 }
  0x2b   : > { %s512_s6 = scalar_lea.vmem %s511_s4, 256  ;;  %p513_p2 = scmp.lt.s32.totalorder %s158_s24, %s511_s4 }
  0x2c   : > { %p508_p9 = pnand %p506_p8, %p494_p7  ;;  %p514_p6 = scmp.lt.s32.totalorder %s512_s6, %s505_s25 }
  0x2e   : > { %p509_p0 = pneg %p508_p9  ;;  %p515_p10 = por %p514_p6, %p513_p2 }
  0x30   : > { %p516_p11 = pnand %p515_p10, %p509_p0 }
  0x32   : > { %519 = shalt.err (!%p516_p11)
}
  0x33   : > { %s608_s5 = smov 128   ;;  %s609_s17 = smov 64  }
  0x34   : > { %s610_s7 = smov 4   ;;  %169 = sbr.rel (%p694_p13) target bundleno = 217 (0xd9), region = 28 }
  0x35   : > { %396 = dma.hbm_to_vmem [thread:$0]  (!%p703_p4), %s156_s16, 128, %s158_s24, %s145_s30, %s608_s5, %s609_s17, %s610_s7  }
  0x36   : > { %s742_s29 = sand.u32 (!%p694_p13), 1, %s588_s10   ;;  %p824_p5 = scmp.ne.s32.totalorder (!%p694_p13), %s818_s20, 0 }
  0x37   : > { %s374_s8 = sshll.u32 (!%p694_p13), %s742_s29, 3  ;;  %s172_s15 = scalar_lea.sflag (!%p694_p13), [#allocation3], %s742_s29 }
  0x38   : > { %s746_s19 = scalar_lea.vmem (!%p694_p13), [#allocation2], %s374_s8 }
  0x39   : > { %571 = dma.done.wait (%p824_p5), %s172_s15, 128  }
  0x3a   : > { %573 = vsyncadd (%p824_p5), %s172_s15, 4294967168 }
  0x3b   : > { %575 = dma.done.wait (%p669_p3), [#allocation6], 32  }
  0x3c   : > { %577 = vsyncadd (%p669_p3), [#allocation6], 4294967264  ;;  %v611_v0 = vmov 0   ;;  %v612_v1 = vmov 2   ;;  %v203_v2 = vld [vmem:[#allocation5] sm:$0x3] }
  0x3d   : > { %461 = vset.pattern.permute.xlu0 %v611_v0  ;;  %463 = vset.pattern.permute.xlu1 %v612_v1  ;;  %v613_v3 = vmov 1   ;;  %v614_v4 = vmov 3   ;;  %v201_v7 = vld [vmem:[%s746_s19] sm:$0x1]  ;;  %v213_v8 = vld [vmem:[%s746_s19 + $0x1] sm:$0x1] }
  0x3e   : > { %206 = vperm.xlu0 %461, %v203_v2   ;;  %228 = vperm.xlu1 %463, %v203_v2   ;;  %v202_v10 = vld [vmem:[%s746_s19 + $0x4] sm:$0x1]  ;;  %v214_v12 = vld [vmem:[%s746_s19 + $0x5] sm:$0x1]  ;;  %v225_v19 = vld [vmem:[%s746_s19 + $0x2] sm:$0x1] }
  0x3f   : > { %v226_v20 = vld [vmem:[%s746_s19 + $0x6] sm:$0x1]  ;;  %v238_v21 = vld [vmem:[%s746_s19 + $0x7] sm:$0x1]  ;;  %s376_s18 = sshll.u32 %s742_s29, 1  ;;  %s378_s20 = sshll.u32 %s596_s12, 5 }
  0x40   : > { %v237_v25 = vld [vmem:[%s746_s19 + $0x3] sm:$0x1]  ;;  %s199_s23 = scalar_lea.vmem [#allocation7], %s376_s18  ;;  %vm252_vm0 = vcmask 1041409   ;;  %s769_s30 = scalar_lea.hbm %s813_s2, %s378_s20 }
  0x41   : > { %s272_s26 = sshll.u32 %s199_s23, 4  ;;  %s257_s25 = scalar_lea.sflag [#allocation4], %s742_s29  ;;  %s273_s26 = int_to_ptr.vmem [resolvable:$true] %s272_s26 }
  0x42   : > { %462 = vset.pattern.permute.xlu0 %v613_v3  ;;  %464 = vset.pattern.permute.xlu1 %v614_v4  ;;  %s520_s3 = scalar_lea.vmem %s273_s26, 32  ;;  %p825_p13 = scmp.ne.s32.totalorder %s819_s21, 0 }
  0x43   : > { %216 = vperm.xlu0 %462, %v203_v2   ;;  %240 = vperm.xlu1 %464, %v203_v2   ;;  %p521_p3 = scmp.ne.s32.totalorder %s273_s26, %s520_s3  ;;  %s615_s12 = smov [#allocation7]  }
  0x44   : > { %s524_s4 = sshll.u32 %s615_s12, 4  ;;  %s525_s4 = int_to_ptr.vmem [resolvable:$false] %s524_s4 }
  0x45   : > { %p522_p4 = pnand %p521_p3, %p825_p13  ;;  %s526_s6 = scalar_lea.vmem %s525_s4, 64 }
  0x46   : > { %p527_p12 = scmp.lt.s32.totalorder %s273_s26, %s525_s4  ;;  %p528_p7 = scmp.lt.s32.totalorder %s526_s6, %s520_s3 }
  0x47   : > { %465 = vset.pattern.permute.xlu0 %v614_v4  ;;  %p523_p1 = pneg %p522_p4 }
  0x48   : > { %p529_p8 = por %p528_p7, %p527_p12 }
  0x4a   : > { %p530_p9 = pnand %p529_p8, %p523_p1 }
  0xb9   : > { %v207_v5 = vpop.permute.xlu0 %206  ;;  %v229_v6 = vpop.permute.xlu1 %228 }
  0xba   : > { %v208_v9 = vrot.slane %v207_v5, 1  ;;  %v211_v11 = vmul.f32 %v207_v5, %v201_v7  ;;  %v230_v15 = vrot.slane %v229_v6, 1  ;;  %v233_v26 = vmul.f32 %v229_v6, %v225_v19 }
  0xbc   : > { %v212_v22 = vmul.f32 %v208_v9, %v202_v10  ;;  %v234_v27 = vmul.f32 %v230_v15, %v226_v20 }
  0xbe   : > { %v217_v13 = vpop.permute.xlu0 %216  ;;  %v241_v14 = vpop.permute.xlu1 %240 }
  0xbf   : > { %v218_v16 = vrot.slane %v217_v13, 1  ;;  %v221_v17 = vmul.f32 %v217_v13, %v213_v8  ;;  %v242_v18 = vrot.slane %v241_v14, 1  ;;  %v245_v32 = vmul.f32 %v241_v14, %v237_v25 }
  0xc1   : > { %v222_v23 = vmul.f32 %v218_v16, %v214_v12  ;;  %v223_v24 = vadd.f32 %v221_v17, %v211_v11  ;;  %v246_v29 = vmul.f32 %v242_v18, %v238_v21 }
  0xc3   : > { %v224_v28 = vadd.f32 %v222_v23, %v212_v22  ;;  %v235_v30 = vadd.f32 %v233_v26, %v223_v24 }
  0xc5   : > { %v236_v31 = vadd.f32 %v234_v27, %v224_v28  ;;  %v247_v34 = vadd.f32 %v245_v32, %v235_v30 }
  0xc7   : > { %v248_v33 = vadd.f32 %v246_v29, %v236_v31 }
  0xc9   : > { %v251_v35 = vrot.slane %v248_v33, 7 }
  0xcb   : > { %v253_v36 = vsel %vm252_vm0, %v251_v35, %v247_v34 }
  0xcc   : > { %255 = vst [vmem:[%s199_s23] sm:$0x3] %v253_v36 }
  0xcd   : > { %533 = shalt.err (!%p530_p9)
}
  0xce   : > { %s534_s5 = scalar_lea.hbm %s769_s30, 32  ;;  %s538_s29 = scalar_lea.hbm %s813_s2, 64 }
  0xcf   : > { %p535_p0 = scmp.ne.s32.totalorder %s769_s30, %s534_s5  ;;  %p539_p10 = scmp.lt.s32.totalorder %s769_s30, %s813_s2 }
  0xd0   : > { %p540_p11 = scmp.lt.s32.totalorder %s538_s29, %s534_s5 }
  0xd1   : > { %p536_p2 = pnand %p535_p0, %p825_p13 }
  0xd2   : > { %p541_p5 = por %p540_p11, %p539_p10 }
  0xd3   : > { %p537_p6 = pneg %p536_p2 }
  0xd5   : > { %p542_p3 = pnand %p541_p5, %p537_p6 }
  0xd7   : > { %545 = shalt.err (!%p542_p3)
}
  0xd8   : > { %387 = dma.vmem_to_hbm [thread:$0]  (%p825_p13), %s273_s26, 32, %s769_s30, %s257_s25  }
  0xd9 PF: > { %s284_s19 = sand.u32 1, %s584_s9   ;;  %p826_p4 = scmp.ne.s32.totalorder %s820_s22, 0 }
  0xda   : > { %p827_p1 = scmp.ge.s32.totalorder %s604_s14, 2  ;;  %s285_s18 = scalar_lea.sflag [#allocation4], %s284_s19 }
  0xdc   : > { %p398_p12 = pnand %p827_p1, %p826_p4 }
  0xde   : > { %p399_p7 = pneg %p398_p12 }
  0xe0   : > { %579 = dma.done.wait (%p399_p7), %s285_s18, 32  }
  0xe1   : > { %581 = vsyncadd (%p399_p7), %s285_s18, 4294967264  ;;  %s19_s14 = sadd.s32 1, %s604_s14   ;;  %s828_s9 = smov %s588_s10 }
  0xe2   : > { %p16_p8 = scmp.ge.s32.totalorder %s19_s14, 4   ;;  %s829_s10 = smov %s592_s11 }
  0xe3   : > { %s830_s11 = smov %s733_s27  ;;  %s831_s12 = smov %s600_s13 }
  0xe4   : > { %s832_s13 = smov %s834_s28  ;;  %18 = sbr.rel (!%p16_p8) target bundleno = 7 (0x7), region = 78 }
  0xe9   :  { %290 = vsyncpa [#allocation3], 1 }
  0xea   :  { %292 = vsyncpa [#allocation3 + $0x1], 1 }
  0xeb   :  { %293 = vsyncpa [#allocation6], 1 }
  0xec   :  { %294 = vsyncpa [#allocation4], 1 }
  0xed   :  { %296 = vsyncpa [#allocation4 + $0x1], 1 }

</bundles_post_ra>
